<compile_context>
chip_gen: v7x
topology: tpu7x:2x2x1
jax: 0.10.0
libtpu: 0.0.40
codegen_flags: <defaults>
</compile_context>

<pallas_src>
import functools

import jax
import jax.numpy as jnp
from jax.experimental import pallas as pl
from jax.experimental.pallas import tpu as pltpu

EPS = 1e-5
MOMENTUM = 0.9

_LANE = 128
_MAX_LANES = 8192                    # cap lane tile (also caps unrolled chunk loop)
_VMEM_LIMIT = 32 * 1024 * 1024       # explicit scoped-VMEM limit (safe on v5e/v6e/v7x)
_FUSED_MAX_F32_BYTES = 2 * 1024 * 1024   # whole-x-in-VMEM fast path threshold


def _tile_budget_bytes():
    """Per-x-tile budget (counted at 4 B/elem). Bigger tiles on newer chips."""
    try:
        kind = jax.devices()[0].device_kind.lower()
    except Exception:
        return 2 * 1024 * 1024
    if "v6" in kind or "v7" in kind:
        return 4 * 1024 * 1024
    return 2 * 1024 * 1024


# --------------------------------------------------------------------------- #
# Kernels
# --------------------------------------------------------------------------- #
def _fused_bn_kernel(x_ref, g_ref, b_ref, y_ref, mean_ref, var_ref, *, count, eps):
    """Single-sweep BN: x resident in VMEM, stats + normalize in one pass.

    x_ref: (N, C, HW)   g_ref/b_ref: (C, 1)
    y_ref: (N, C, HW)   mean_ref/var_ref: (C, 1)
    """
    x = x_ref[...].astype(jnp.float32)                                  # (N, C, HW)
    mean = jnp.sum(jnp.sum(x, axis=0), axis=1, keepdims=True) / count   # (C, 1)
    d = x - mean[None]
    var = jnp.sum(jnp.sum(d * d, axis=0), axis=1, keepdims=True) / count
    inv_std = jax.lax.rsqrt(var + eps)
    scale = g_ref[...] * inv_std                                         # (C, 1)
    shift = b_ref[...] - mean * scale
    y_ref[...] = (x * scale[None] + shift[None]).astype(y_ref.dtype)
    mean_ref[...] = mean
    var_ref[...] = var


def _stats_kernel(x_ref, sum_ref, sq_ref, *, L, Lt, Nb, need_mask):
    """Accumulate per-channel sum / sum-of-squares over (Nb, C, Lt) tiles.

    x_ref  : (Nb, C, Lt) current input tile
    sum_ref: (C, 128)    resident f32 accumulator for this n-slice
    sq_ref : (C, 128)    (cross-lane / cross-n reduce done in the epilogue)
    """
    l = pl.program_id(1)
    C = x_ref.shape[1]

    @pl.when(l == 0)
    def _init():
        sum_ref[...] = jnp.zeros_like(sum_ref)
        sq_ref[...] = jnp.zeros_like(sq_ref)

    def accumulate(masked):
        if Lt % _LANE == 0:
            nchunks = Lt // _LANE
            # Local partial accumulators (no per-chunk RMW on the resident
            # refs; 4-way split exposes ILP across the VALU slots).
            nacc = min(4, max(1, Nb * nchunks))
            parts_s = [jnp.zeros((C, _LANE), jnp.float32) for _ in range(nacc)]
            parts_q = [jnp.zeros((C, _LANE), jnp.float32) for _ in range(nacc)]
            idx = 0
            for b in range(Nb):
                for j in range(nchunks):
                    # Per-chunk load + cast: no full-tile f32 temp for bf16/int8.
                    xc = x_ref[b, :, j * _LANE:(j + 1) * _LANE].astype(jnp.float32)
                    if masked:
                        off = (l * Lt + j * _LANE
                               + jax.lax.broadcasted_iota(jnp.int32, (C, _LANE), 1))
                        xc = jnp.where(off < L, xc, 0.0)
                    k = idx % nacc
                    parts_s[k] = parts_s[k] + xc
                    parts_q[k] = parts_q[k] + xc * xc
                    idx += 1
            local_s = parts_s[0]
            local_q = parts_q[0]
            for k in range(1, nacc):
                local_s = local_s + parts_s[k]
                local_q = local_q + parts_q[k]
            # Single resident-ref update per grid step.
            sum_ref[...] += local_s
            sq_ref[...] += local_q
        else:
            # Ragged lane width: only possible when Lt == full HW (never masked).
            s_col = jnp.zeros((C, 1), jnp.float32)
            q_col = jnp.zeros((C, 1), jnp.float32)
            for b in range(Nb):
                xb = x_ref[b].astype(jnp.float32)                        # (C, Lt)
                s_col = s_col + jnp.sum(xb, axis=-1, keepdims=True)
                q_col = q_col + jnp.sum(xb * xb, axis=-1, keepdims=True)
            sum_ref[:, 0:1] += s_col
            sq_ref[:, 0:1] += q_col

    if need_mask:
        # Only the final partial tile pays the iota + compare + select cost.
        last = pl.num_programs(1) - 1

        @pl.when(l != last)
        def _main():
            accumulate(False)

        @pl.when(l == last)
        def _tail():
            accumulate(True)
    else:
        accumulate(False)


def _scale_shift_kernel(x_ref, scale_ref, shift_ref, y_ref):
    """y = x * scale + shift with per-channel (C, 1) scale/shift columns."""
    scale = scale_ref[...][None]                                         # (1, C, 1)
    shift = shift_ref[...][None]
    x = x_ref[...].astype(jnp.float32)                                   # (Nb, C, Lt)
    y_ref[...] = (x * scale + shift).astype(y_ref.dtype)


# --------------------------------------------------------------------------- #
# Tiling choice
# --------------------------------------------------------------------------- #
def _choose_tiles(N, C, HW, itemsize, budget):
    """Pick (Nb, Lt): lane tile Lt (full HW or a 128-multiple), batch fold Nb."""
    eff = max(int(itemsize), 4)      # budget in f32-equivalent bytes (bf16-safe)
    max_lt = (budget // max(1, C * eff)) // _LANE * _LANE
    max_lt = max(_LANE, min(max_lt, _MAX_LANES))

    if HW <= max_lt:
        Lt = HW                       # full extent: always a legal block dim
    else:
        Lt = None
        lt = max_lt
        while lt >= _LANE:            # prefer a divisor (no masked partial tile)
            if HW % lt == 0:
                Lt = lt
                break
            lt -= _LANE
        if Lt is None:
            Lt = max_lt               # no divisor: last tile partial (masked)

    Nb = 1
    if Lt == HW:                      # whole spatial fits -> fold batch rows in
        per_n = max(1, C * Lt * eff)
        nb_cap = max(1, min(N, budget // per_n))
        for nb in range(nb_cap, 0, -1):
            if N % nb == 0:
                Nb = nb
                break
    return Nb, Lt


# --------------------------------------------------------------------------- #
# pallas_call wrappers
# --------------------------------------------------------------------------- #
def _fused_forward(x3, g2, b2, eps):
    N, C, HW = x3.shape
    kernel = functools.partial(_fused_bn_kernel, count=float(N * HW), eps=float(eps))
    y3, mean2, var2 = pl.pallas_call(
        kernel,
        out_shape=(
            jax.ShapeDtypeStruct((N, C, HW), x3.dtype),
            jax.ShapeDtypeStruct((C, 1), jnp.float32),
            jax.ShapeDtypeStruct((C, 1), jnp.float32),
        ),
        grid=(1,),
        in_specs=[
            pl.BlockSpec((N, C, HW), lambda i: (0, 0, 0)),
            pl.BlockSpec((C, 1), lambda i: (0, 0)),
            pl.BlockSpec((C, 1), lambda i: (0, 0)),
        ],
        out_specs=(
            pl.BlockSpec((N, C, HW), lambda i: (0, 0, 0)),
            pl.BlockSpec((C, 1), lambda i: (0, 0)),
            pl.BlockSpec((C, 1), lambda i: (0, 0)),
        ),
        compiler_params=pltpu.CompilerParams(
            dimension_semantics=("arbitrary",),
            vmem_limit_bytes=_VMEM_LIMIT),
    )(x3, g2, b2)
    return y3, mean2[:, 0], var2[:, 0]


def _channel_stats(x3, Nb, Lt):
    """x3: (N, C, HW) -> per-channel (sum, sum_sq) as f32 (C,) arrays."""
    N, C, HW = x3.shape
    need_mask = (HW % Lt) != 0
    num_n = N // Nb
    num_l = pl.cdiv(HW, Lt)

    kernel = functools.partial(_stats_kernel, L=HW, Lt=Lt, Nb=Nb, need_mask=need_mask)
    sum_p, sq_p = pl.pallas_call(
        kernel,
        out_shape=(
            jax.ShapeDtypeStruct((num_n, C, _LANE), jnp.float32),
            jax.ShapeDtypeStruct((num_n, C, _LANE), jnp.float32),
        ),
        grid=(num_n, num_l),
        in_specs=[pl.BlockSpec((Nb, C, Lt), lambda n, l: (n, 0, l))],
        out_specs=(
            pl.BlockSpec((None, C, _LANE), lambda n, l: (n, 0, 0)),
            pl.BlockSpec((None, C, _LANE), lambda n, l: (n, 0, 0)),
        ),
        compiler_params=pltpu.CompilerParams(
            dimension_semantics=("parallel", "arbitrary"),   # n-axis megacore on v7x
            vmem_limit_bytes=_VMEM_LIMIT),
    )(x3)
    # Tiny (num_n, C, 128) arrays: final n/lane reduce outside the kernel.
    return jnp.sum(sum_p, axis=(0, 2)), jnp.sum(sq_p, axis=(0, 2))


def _apply_scale_shift(x3, scale_c, shift_c, Nb, Lt, out_dtype):
    N, C, HW = x3.shape
    num_n = N // Nb
    num_l = pl.cdiv(HW, Lt)
    scale2 = scale_c.reshape(C, 1).astype(jnp.float32)
    shift2 = shift_c.reshape(C, 1).astype(jnp.float32)
    return pl.pallas_call(
        _scale_shift_kernel,
        out_shape=jax.ShapeDtypeStruct((N, C, HW), out_dtype),
        grid=(num_n, num_l),
        in_specs=[
            pl.BlockSpec((Nb, C, Lt), lambda n, l: (n, 0, l)),
            pl.BlockSpec((C, 1), lambda n, l: (0, 0)),
            pl.BlockSpec((C, 1), lambda n, l: (0, 0)),
        ],
        out_specs=pl.BlockSpec((Nb, C, Lt), lambda n, l: (n, 0, l)),
        compiler_params=pltpu.CompilerParams(
            dimension_semantics=("parallel", "parallel"),
            vmem_limit_bytes=_VMEM_LIMIT),
    )(x3, scale2, shift2)


# --------------------------------------------------------------------------- #
# Public forward
# --------------------------------------------------------------------------- #
@functools.partial(jax.jit, static_argnames=("training",))
def batch_norm2d(x, gamma, beta, moving_mean, moving_var, *, training=True,
                 eps=EPS, momentum=MOMENTUM):
    """x: (N, C, H, W); gamma/beta/moving_*: (1, C, 1, 1).
    Returns (y, new_moving_mean, new_moving_var)."""
    N, C, H, W = x.shape
    HW = H * W
    x3 = x.reshape(N, C, HW)          # free view: no transpose / no data movement

    g = gamma.reshape(C).astype(jnp.float32)
    b = beta.reshape(C).astype(jnp.float32)
    mm = moving_mean.reshape(C).astype(jnp.float32)
    mv = moving_var.reshape(C).astype(jnp.float32)

    budget = _tile_budget_bytes()
    itemsize = jnp.dtype(x.dtype).itemsize

    if training:
        if N * C * HW * 4 <= _FUSED_MAX_F32_BYTES:
            # Single-sweep fast path: 2 HBM passes, two-pass (exact) variance.
            y3, mean, var = _fused_forward(x3, g.reshape(C, 1), b.reshape(C, 1), eps)
        else:
            # Two-sweep tiled path: 3 HBM passes.
            Nb, Lt = _choose_tiles(N, C, HW, itemsize, budget)
            s, sq = _channel_stats(x3, Nb, Lt)
            count = jnp.float32(N * HW)
            mean = s / count
            var = jnp.maximum(sq / count - mean * mean, 0.0)   # biased var (spec)
            inv_std = jax.lax.rsqrt(var + jnp.float32(eps))
            scale = g * inv_std
            shift = b - mean * scale
            y3 = _apply_scale_shift(x3, scale, shift, Nb, Lt, x.dtype)
        new_mm = momentum * mm + (1.0 - momentum) * mean
        new_mv = momentum * mv + (1.0 - momentum) * var
    else:
        mean, var = mm, mv
        new_mm, new_mv = mm, mv
        Nb, Lt = _choose_tiles(N, C, HW, itemsize, budget)
        inv_std = jax.lax.rsqrt(var + jnp.float32(eps))
        scale = g * inv_std
        shift = b - mean * scale
        y3 = _apply_scale_shift(x3, scale, shift, Nb, Lt, x.dtype)

    y = y3.reshape(N, C, H, W)
    return y, new_mm.reshape(1, C, 1, 1), new_mv.reshape(1, C, 1, 1)


class BatchNorm2d:
    """JAX/Pallas port of the torch module (training-mode forward by default)."""

    def __init__(self, num_features):
        shape = (1, num_features, 1, 1)
        self.gamma = jnp.ones(shape, jnp.float32)
        self.beta = jnp.zeros(shape, jnp.float32)
        self.moving_mean = jnp.zeros(shape, jnp.float32)
        self.moving_var = jnp.ones(shape, jnp.float32)
        self.training = True

    def __call__(self, x):
        y, self.moving_mean, self.moving_var = batch_norm2d(
            x, self.gamma, self.beta, self.moving_mean, self.moving_var,
            training=self.training)
        return y


# --------------------------------------------------------------------------- #
# Reference + tests
# --------------------------------------------------------------------------- #
def _reference(x, gamma, beta, moving_mean, moving_var):
    mean = x.mean(axis=(0, 2, 3), keepdims=True)
    var = ((x - mean) ** 2).mean(axis=(0, 2, 3), keepdims=True)
    x_hat = (x - mean) / jnp.sqrt(var + EPS)
    y = gamma * x_hat + beta
    new_mm = MOMENTUM * moving_mean + (1.0 - MOMENTUM) * mean
    new_mv = MOMENTUM * moving_var + (1.0 - MOMENTUM) * var
    return y, new_mm, new_mv


if __name__ == "__main__":
    key = jax.random.PRNGKey(0)
    k1, k2 = jax.random.split(key)

    # ---- Test 1: module-spec shape -> fused single-sweep path ------------- #
    N, C, H, W = 2, 4, 16, 16
    x = jax.random.normal(k1, (N, C, H, W), dtype=jnp.float32) * 2.0 + 0.5

    bn = BatchNorm2d(C)
    y = bn(x)
    jax.block_until_ready(y)
    jax.block_until_ready(bn.moving_mean)
    jax.block_until_ready(bn.moving_var)

    y_ref, mm_ref, mv_ref = _reference(
        x, jnp.ones((1, C, 1, 1)), jnp.zeros((1, C, 1, 1)),
        jnp.zeros((1, C, 1, 1)), jnp.ones((1, C, 1, 1)))
    assert jnp.allclose(y, y_ref, atol=1e-4, rtol=1e-4), \
        float(jnp.max(jnp.abs(y - y_ref)))
    assert jnp.allclose(bn.moving_mean, mm_ref, atol=1e-5, rtol=1e-5)
    assert jnp.allclose(bn.moving_var, mv_ref, atol=1e-5, rtol=1e-5)

    # ---- Test 2: larger shape -> tiled two-sweep (stats + normalize) ------ #
    N2, C2, H2, W2 = 2, 16, 192, 192
    x2 = jax.random.normal(k2, (N2, C2, H2, W2), dtype=jnp.float32) * 1.5 - 0.3
    g2 = jnp.ones((1, C2, 1, 1), jnp.float32)
    b2 = jnp.zeros((1, C2, 1, 1), jnp.float32)
    mm2 = jnp.zeros((1, C2, 1, 1), jnp.float32)
    mv2 = jnp.ones((1, C2, 1, 1), jnp.float32)

    y2, nmm2, nmv2 = batch_norm2d(x2, g2, b2, mm2, mv2, training=True)
    jax.block_until_ready(y2)

    y2_ref, mm2_ref, mv2_ref = _reference(x2, g2, b2, mm2, mv2)
    assert jnp.allclose(y2, y2_ref, atol=2e-3, rtol=2e-3), \
        float(jnp.max(jnp.abs(y2 - y2_ref)))
    assert jnp.allclose(nmm2, mm2_ref, atol=1e-4, rtol=1e-4)
    assert jnp.allclose(nmv2, mv2_ref, atol=1e-3, rtol=1e-3)

    print("KERNEL_OK")
</pallas_src>

<mosaic_0001>
module attributes {stable_mosaic.version = 11 : i64} {
  func.func @_fused_bn_kernel(%arg0: i32, %arg1: memref<2x4x256xf32, #tpu.memory_space<vmem>>, %arg2: memref<4x1xf32, #tpu.memory_space<vmem>>, %arg3: memref<4x1xf32, #tpu.memory_space<vmem>>, %arg4: memref<2x4x256xf32, #tpu.memory_space<vmem>>, %arg5: memref<4x1xf32, #tpu.memory_space<vmem>>, %arg6: memref<4x1xf32, #tpu.memory_space<vmem>>) attributes {dimension_semantics = [#tpu.dimension_semantics<arbitrary>], iteration_bounds = array<i64: 1>, scalar_prefetch = 0 : i64, scratch_operands = 0 : i64, tpu.core_type = #tpu.core_type<tc>, window_params = [{pipeline_mode = #tpu.pipeline_mode<synchronous>, transform_indices = @transform_0, window_bounds = array<i64: 2, 4, 256>}, {pipeline_mode = #tpu.pipeline_mode<synchronous>, transform_indices = @transform_1, window_bounds = array<i64: 4, 1>}, {pipeline_mode = #tpu.pipeline_mode<synchronous>, transform_indices = @transform_2, window_bounds = array<i64: 4, 1>}, {pipeline_mode = #tpu.pipeline_mode<synchronous>, transform_indices = @transform_3, window_bounds = array<i64: 2, 4, 256>}, {pipeline_mode = #tpu.pipeline_mode<synchronous>, transform_indices = @transform_4, window_bounds = array<i64: 4, 1>}, {pipeline_mode = #tpu.pipeline_mode<synchronous>, transform_indices = @transform_5, window_bounds = array<i64: 4, 1>}]} {
    %c0 = arith.constant 0 : index
    %c0_0 = arith.constant 0 : index
    %c0_1 = arith.constant 0 : index
    %0 = vector.load %arg1[%c0, %c0_0, %c0_1] : memref<2x4x256xf32, #tpu.memory_space<vmem>>, vector<2x4x256xf32>
    %cst = arith.constant dense<0.000000e+00> : vector<4x256xf32>
    %1 = vector.multi_reduction <add>, %0, %cst [0] : vector<2x4x256xf32> to vector<4x256xf32>
    %cst_2 = arith.constant dense<0.000000e+00> : vector<4xf32>
    %2 = vector.multi_reduction <add>, %1, %cst_2 [1] : vector<4x256xf32> to vector<4xf32>
    %3 = vector.shape_cast %2 : vector<4xf32> to vector<4x1xf32>
    %cst_3 = arith.constant 5.120000e+02 : f32
    %4 = vector.broadcast %cst_3 : f32 to vector<4x1xf32>
    %5 = arith.divf %3, %4 : vector<4x1xf32>
    %6 = vector.shape_cast %5 : vector<4x1xf32> to vector<1x4x1xf32>
    %7 = vector.broadcast %6 : vector<1x4x1xf32> to vector<2x4x256xf32>
    %8 = arith.subf %0, %7 : vector<2x4x256xf32>
    %9 = arith.mulf %8, %8 : vector<2x4x256xf32>
    %cst_4 = arith.constant dense<0.000000e+00> : vector<4x256xf32>
    %10 = vector.multi_reduction <add>, %9, %cst_4 [0] : vector<2x4x256xf32> to vector<4x256xf32>
    %cst_5 = arith.constant dense<0.000000e+00> : vector<4xf32>
    %11 = vector.multi_reduction <add>, %10, %cst_5 [1] : vector<4x256xf32> to vector<4xf32>
    %12 = vector.shape_cast %11 : vector<4xf32> to vector<4x1xf32>
    %cst_6 = arith.constant 5.120000e+02 : f32
    %13 = vector.broadcast %cst_6 : f32 to vector<4x1xf32>
    %14 = arith.divf %12, %13 : vector<4x1xf32>
    %cst_7 = arith.constant 9.99999974E-6 : f32
    %15 = vector.broadcast %cst_7 : f32 to vector<4x1xf32>
    %16 = arith.addf %14, %15 : vector<4x1xf32>
    %17 = math.rsqrt %16 : vector<4x1xf32>
    %c0_8 = arith.constant 0 : index
    %c0_9 = arith.constant 0 : index
    %18 = vector.load %arg2[%c0_8, %c0_9] : memref<4x1xf32, #tpu.memory_space<vmem>>, vector<4x1xf32>
    %19 = arith.mulf %18, %17 : vector<4x1xf32>
    %c0_10 = arith.constant 0 : index
    %c0_11 = arith.constant 0 : index
    %20 = vector.load %arg3[%c0_10, %c0_11] : memref<4x1xf32, #tpu.memory_space<vmem>>, vector<4x1xf32>
    %21 = arith.mulf %5, %19 : vector<4x1xf32>
    %22 = arith.subf %20, %21 : vector<4x1xf32>
    %23 = vector.shape_cast %19 : vector<4x1xf32> to vector<1x4x1xf32>
    %24 = vector.broadcast %23 : vector<1x4x1xf32> to vector<2x4x256xf32>
    %25 = arith.mulf %0, %24 : vector<2x4x256xf32>
    %26 = vector.shape_cast %22 : vector<4x1xf32> to vector<1x4x1xf32>
    %27 = vector.broadcast %26 : vector<1x4x1xf32> to vector<2x4x256xf32>
    %28 = arith.addf %25, %27 : vector<2x4x256xf32>
    %c0_12 = arith.constant 0 : index
    %c0_13 = arith.constant 0 : index
    %c0_14 = arith.constant 0 : index
    %29 = vector.load %arg4[%c0_12, %c0_13, %c0_14] : memref<2x4x256xf32, #tpu.memory_space<vmem>>, vector<2x4x256xf32>
    tpu.vector_store %arg4[%c0_12, %c0_13, %c0_14], %28 {strides = array<i32>} : memref<2x4x256xf32, #tpu.memory_space<vmem>>, vector<2x4x256xf32>,
    %c0_15 = arith.constant 0 : index
    %c0_16 = arith.constant 0 : index
    %30 = vector.load %arg5[%c0_15, %c0_16] : memref<4x1xf32, #tpu.memory_space<vmem>>, vector<4x1xf32>
    tpu.vector_store %arg5[%c0_15, %c0_16], %5 {strides = array<i32>} : memref<4x1xf32, #tpu.memory_space<vmem>>, vector<4x1xf32>,
    %c0_17 = arith.constant 0 : index
    %c0_18 = arith.constant 0 : index
    %31 = vector.load %arg6[%c0_17, %c0_18] : memref<4x1xf32, #tpu.memory_space<vmem>>, vector<4x1xf32>
    tpu.vector_store %arg6[%c0_17, %c0_18], %14 {strides = array<i32>} : memref<4x1xf32, #tpu.memory_space<vmem>>, vector<4x1xf32>,
    return
  }
  func.func @transform_0(%arg0: i32) -> (i32, i32, i32) {
    %c0_i32 = arith.constant 0 : i32
    %c0_i32_0 = arith.constant 0 : i32
    %c0_i32_1 = arith.constant 0 : i32
    %c0_i32_2 = arith.constant 0 : i32
    return %c0_i32, %c0_i32_0, %c0_i32_1 : i32, i32, i32
  }
  func.func @transform_1(%arg0: i32) -> (i32, i32) {
    %c0_i32 = arith.constant 0 : i32
    %c0_i32_0 = arith.constant 0 : i32
    %c0_i32_1 = arith.constant 0 : i32
    return %c0_i32, %c0_i32_0 : i32, i32
  }
  func.func @transform_2(%arg0: i32) -> (i32, i32) {
    %c0_i32 = arith.constant 0 : i32
    %c0_i32_0 = arith.constant 0 : i32
    %c0_i32_1 = arith.constant 0 : i32
    return %c0_i32, %c0_i32_0 : i32, i32
  }
  func.func @transform_3(%arg0: i32) -> (i32, i32, i32) {
    %c0_i32 = arith.constant 0 : i32
    %c0_i32_0 = arith.constant 0 : i32
    %c0_i32_1 = arith.constant 0 : i32
    %c0_i32_2 = arith.constant 0 : i32
    return %c0_i32, %c0_i32_0, %c0_i32_1 : i32, i32, i32
  }
  func.func @transform_4(%arg0: i32) -> (i32, i32) {
    %c0_i32 = arith.constant 0 : i32
    %c0_i32_0 = arith.constant 0 : i32
    %c0_i32_1 = arith.constant 0 : i32
    return %c0_i32, %c0_i32_0 : i32, i32
  }
  func.func @transform_5(%arg0: i32) -> (i32, i32) {
    %c0_i32 = arith.constant 0 : i32
    %c0_i32_0 = arith.constant 0 : i32
    %c0_i32_1 = arith.constant 0 : i32
    return %c0_i32, %c0_i32_0 : i32, i32
  }
}

</mosaic_0001>

<bundles_post_ra>
// kernel: batch_norm2d.1
= control target key start
LH: loop header
LB: loop body
LE: loop exit
PB: predicated region body
PF: predicated region fallthrough
CT: control target
= control target key end

     0   :  { %vm25_vm0 = vcmask 1043456   ;;  %v130_v13 = vmov 839922192   ;;  %v43_v15 = vlaneseq  ;;  %vm107_vm1 = vcmask 3072   ;;  %s214_s0 = inlined_call_operand.vmem [shape: f32[2,4,256], index: 0, kind: input, shape index: {}]   ;;  %s215_s4 = inlined_call_operand.vmem [shape: f32[4,1], index: 4, kind: output, shape index: {1}]   ;;  %s216_s5 = inlined_call_operand.vmem [shape: f32[4,1], index: 5, kind: output, shape index: {2}]   ;;  %s217_s1 = inlined_call_operand.vmem [shape: f32[4,1], index: 1, kind: input, shape index: {}]   ;;  %s218_s2 = inlined_call_operand.vmem [shape: f32[4,1], index: 2, kind: input, shape index: {}]   ;;  %s219_s3 = inlined_call_operand.vmem [shape: f32[2,4,256], index: 3, kind: output, shape index: {0}]  }
   0x1   :  { %v165_v0 = vld [vmem:[%s214_s0] sm:$0xff]  ;;  %v170_v1 = vld [vmem:[%s214_s0 + $0x8] sm:$0xff]  ;;  %v41_v14 = vunpack.c.l.s4 %v130_v13  ;;  %v131_v37 = vmov 0  }
   0x2   :  { %v21_v2 = vcombine.high %v165_v0, %v165_v0  ;;  %v22_v3 = vcombine.high %v170_v1, %v170_v1  ;;  %v26_v4 = vsel %vm25_vm0, %v165_v0, 0.0  ;;  %v27_v5 = vsel %vm25_vm0, %v170_v1, 0.0  ;;  %124 = vset.pattern.permute.xlu1 %v131_v37  ;;  %125 = vset.pattern.permute.xlu0 %v131_v37  ;;  %v72_v41 = vld [vmem:[%s217_s1] sm:$0xf] }
   0x3   :  { %v28_v6 = vadd.f32 %v27_v5, %v26_v4  ;;  %v42_v16 = vunpack.c.0.s8 %v41_v14  ;;  %v44_v17 = vshrl.u32 %v43_v15, 7  ;;  %v74_v44 = vld [vmem:[%s218_s2] sm:$0xf] }
   0x4   :  { %v29_v7 = vsel %vm25_vm0, %v21_v2, 0.0  ;;  %v30_v8 = vsel %vm25_vm0, %v22_v3, 0.0 }
   0x5   :  { %v31_v9 = vadd.f32 %v30_v8, %v29_v7  ;;  %v32_v10 = vsel %vm25_vm0, %v28_v6, 0.0  ;;  %v45_v18 = vsub.s32 %v42_v16, %v44_v17 }
   0x7   :  { %v33_v11 = vsel %vm25_vm0, %v31_v9, 0.0 }
   0x8   :  { %v34_v12 = vadd.f32 %v33_v11, %v32_v10 }
   0xa   :  { %35 = vadd.xlane.f32.xlu0 %v34_v12 }
  0x97   :  { %v36_v19 = vpop.xlane.xlu0 %35 }
  0x98   :  { %v38_v20 = vmul.f32 0.001953125, %v36_v19 }
  0x9a   :  { %v46_v21 = vrot.slane %v38_v20, %v45_v18  ;;  %108 = vst.msk [vmem:[%s215_s4] sm:$0xf] %vm107_vm1, %v38_v20 }
  0x9c   :  { %v48_v22 = vsub.f32 %v165_v0, %v46_v21  ;;  %v49_v23 = vsub.f32 %v170_v1, %v46_v21 }
  0x9e   :  { %v50_v24 = vmul.f32 %v48_v22, %v48_v22  ;;  %v51_v25 = vmul.f32 %v49_v23, %v49_v23 }
  0xa0   :  { %v54_v26 = vcombine.high %v50_v24, %v50_v24  ;;  %v55_v27 = vcombine.high %v51_v25, %v51_v25  ;;  %v58_v28 = vsel %vm25_vm0, %v50_v24, 0.0  ;;  %v59_v29 = vsel %vm25_vm0, %v51_v25, 0.0 }
  0xa1   :  { %v60_v30 = vadd.f32 %v59_v29, %v58_v28 }
  0xa2   :  { %v61_v31 = vsel %vm25_vm0, %v54_v26, 0.0  ;;  %v62_v32 = vsel %vm25_vm0, %v55_v27, 0.0 }
  0xa3   :  { %v63_v33 = vadd.f32 %v62_v32, %v61_v31  ;;  %v64_v34 = vsel %vm25_vm0, %v60_v30, 0.0 }
  0xa5   :  { %v65_v35 = vsel %vm25_vm0, %v63_v33, 0.0 }
  0xa6   :  { %v66_v36 = vadd.f32 %v65_v35, %v64_v34 }
  0xa8   :  { %67 = vadd.xlane.f32.xlu0 %v66_v36 }
 0x135   :  { %v68_v38 = vpop.xlane.xlu0 %67 }
 0x136   :  { %v69_v39 = vmul.f32 0.001953125, %v68_v38 }
 0x138   :  { %v70_v40 = vadd.f32 1e-05, %v69_v39  ;;  %109 = vst.msk [vmem:[%s216_s5] sm:$0xf] %vm107_vm1, %v69_v39 }
 0x13a   :  { %128 = vrsqrt.f32 %v70_v40 }
 0x144   :  { %v129_v42 = vpop.eup %128 }
 0x145   :  { %v73_v43 = vmul.f32 %v129_v42, %v72_v41 }
 0x147   :  { %79 = vperm.xlu1 %124, %v73_v43   ;;  %v75_v45 = vmul.f32 %v73_v43, %v38_v20 }
 0x149   :  { %v76_v46 = vsub.f32 %v74_v44, %v75_v45 }
 0x14b   :  { %93 = vperm.xlu1 %124, %v76_v46  }
 0x1c6   :  { %v80_v47 = vpop.permute.xlu1 %79 }
 0x1c7   :  { %v87_v48 = vrot.slane %v80_v47, %v45_v18 }
 0x1c9   :  { %v89_v50 = vmul.f32 %v87_v48, %v165_v0  ;;  %v90_v51 = vmul.f32 %v87_v48, %v170_v1 }
 0x1ca   :  { %v94_v49 = vpop.permute.xlu1 %93 }
 0x1cb   :  { %v101_v52 = vrot.slane %v94_v49, %v45_v18 }
 0x1cd   :  { %v103_v53 = vadd.f32 %v101_v52, %v89_v50  ;;  %v104_v54 = vadd.f32 %v101_v52, %v90_v51 }
 0x1cf   :  { %105 = vst [vmem:[%s219_s3] sm:$0xff] %v103_v53  ;;  %106 = vst [vmem:[%s219_s3 + $0x8] sm:$0xff] %v104_v54 }

</bundles_post_ra>
